<compile_context>
chip_gen: v5e
topology: v5e:2x2
jax: 0.10.0
libtpu: 0.0.40
codegen_flags: <defaults>
</compile_context>

<pallas_src>
import functools

import jax
import jax.numpy as jnp
from jax.experimental import pallas as pl
from jax.experimental.pallas import tpu as pltpu


# --------------------------------------------------------------------------
# Shared Sobel math (separable 3x3, replicate padding), on a (1, H, W) block.
# --------------------------------------------------------------------------
def _sobel_sq_mag(x, normalized):
    """Squared Sobel magnitude + 1e-6 for a [1, H, W] float32 block.

    Separable kornia Sobel (kx = [1,2,1]^T x [-1,0,1], ky = kx^T) with
    replicate (edge-clamp) padding; replicate padding clamps per-axis so the
    separable form is exact.  Returns gx^2 + gy^2 (+ kornia's eps=1e-6 that
    lives inside the magnitude sqrt).
    """
    # --- gx: smooth along H with [1, 2, 1], central difference along W ---
    up = jnp.concatenate([x[:, :1, :], x[:, :-1, :]], axis=1)      # x[i-1, j]
    down = jnp.concatenate([x[:, 1:, :], x[:, -1:, :]], axis=1)    # x[i+1, j]
    row = up + 2.0 * x + down
    gx = (jnp.concatenate([row[:, :, 1:], row[:, :, -1:]], axis=2)   # row[., j+1]
          - jnp.concatenate([row[:, :, :1], row[:, :, :-1]], axis=2))  # row[., j-1]

    # --- gy: smooth along W with [1, 2, 1], central difference along H ---
    left = jnp.concatenate([x[:, :, :1], x[:, :, :-1]], axis=2)    # x[i, j-1]
    right = jnp.concatenate([x[:, :, 1:], x[:, :, -1:]], axis=2)   # x[i, j+1]
    col = left + 2.0 * x + right
    gy = (jnp.concatenate([col[:, 1:, :], col[:, -1:, :]], axis=1)   # col[i+1, .]
          - jnp.concatenate([col[:, :1, :], col[:, :-1, :]], axis=1))  # col[i-1, .]

    m2 = gx * gx + gy * gy
    if normalized:
        # kornia normalize_kernel2d divides the kernel by its L1 norm (= 8).
        m2 = m2 * (1.0 / 64.0)
    return m2 + 1e-6


# --------------------------------------------------------------------------
# Pass 1: global max of the squared gradient magnitude.
# --------------------------------------------------------------------------
def _max_pass_kernel(img_ref, max_ref, *, normalized):
    """Running global max of m2, accumulated across the sequential grid."""

    @pl.when(pl.program_id(0) == 0)
    def _init():
        max_ref[...] = jnp.zeros_like(max_ref)   # m2 >= 1e-6 > 0

    m2 = _sobel_sq_mag(img_ref[...].astype(jnp.float32), normalized)
    max_ref[...] = jnp.maximum(max_ref[...], jnp.max(m2))


# --------------------------------------------------------------------------
# Pass 2: recompute m2 and threshold / normalize.
# --------------------------------------------------------------------------
def _binary_kernel(max_ref, img_ref, out_ref, *, eps, normalized):
    """(sqrt(m2) / g_max > eps)  <=>  (m2 > eps^2 * max(m2)); no sqrt/divide."""
    m2 = _sobel_sq_mag(img_ref[...].astype(jnp.float32), normalized)
    thr = (eps * eps) * max_ref[0, 0]
    out_ref[...] = (m2 > thr).astype(out_ref.dtype)


def _gradient_kernel(max_ref, img_ref, out_ref, *, normalized):
    """sqrt(m2) / g_max  with g_max = sqrt(max(m2)) = max(sqrt(m2))."""
    m2 = _sobel_sq_mag(img_ref[...].astype(jnp.float32), normalized)
    inv_gmax = 1.0 / jnp.sqrt(max_ref[0, 0])
    out_ref[...] = (jnp.sqrt(m2) * inv_gmax).astype(out_ref.dtype)


# --------------------------------------------------------------------------
# Wrapper
# --------------------------------------------------------------------------
def boundary_aware_prior(image, eps=0.05, as_gradient=False, normalized=False):
    """image: [B, C, H, W], data in [0, 1].  Returns f32 [B, C, H, W].

    as_gradient=False -> binary boundary map ((sobel / global_max) > eps).
    as_gradient=True  -> globally max-normalized Sobel gradient magnitude.
    """
    B, C, H, W = image.shape
    BC = B * C
    x = image.reshape(BC, H, W)          # free reshape; kernel casts to f32

    # ---- pass 1: global max of m2 (grid axis is a reduction -> arbitrary) ----
    m2_max = pl.pallas_call(
        functools.partial(_max_pass_kernel, normalized=bool(normalized)),
        out_shape=jax.ShapeDtypeStruct((8, 128), jnp.float32),
        grid=(BC,),
        in_specs=[pl.BlockSpec((1, H, W), lambda i: (i, 0, 0))],
        out_specs=pl.BlockSpec((8, 128), lambda i: (0, 0)),   # resident accumulator
        compiler_params=pltpu.CompilerParams(
            dimension_semantics=("arbitrary",)),
    )(x)

    # ---- pass 2: recompute m2 and threshold/normalize (fully parallel) ----
    if as_gradient:
        kern = functools.partial(_gradient_kernel, normalized=bool(normalized))
    else:
        kern = functools.partial(_binary_kernel, eps=float(eps),
                                 normalized=bool(normalized))

    out = pl.pallas_call(
        kern,
        out_shape=jax.ShapeDtypeStruct((BC, H, W), jnp.float32),
        grid=(BC,),
        in_specs=[
            pl.BlockSpec((8, 128), lambda i: (0, 0)),      # global-max tile (resident)
            pl.BlockSpec((1, H, W), lambda i: (i, 0, 0)),  # one channel per step
        ],
        out_specs=pl.BlockSpec((1, H, W), lambda i: (i, 0, 0)),
        compiler_params=pltpu.CompilerParams(
            dimension_semantics=("parallel",)),            # megacore-shardable (v7x)
    )(m2_max, x)

    return out.reshape(B, C, H, W)


class BoundaryAwarePrior:
    """JAX/Pallas port of mon BoundaryAwarePrior (no learnable parameters).

    Note: the original forward calls
        boundary_aware_prior(image, self.eps, self.normalized)
    which binds ``self.normalized`` to the ``as_gradient`` slot, leaving the
    Sobel-kernel ``normalized`` flag at its default (False).  We reproduce
    that binding faithfully — do not "fix" it in a refactor.
    """

    def __init__(self, eps: float = 0.05, normalized: bool = False):
        self.eps = eps
        self.normalized = normalized

    def __call__(self, image):
        return boundary_aware_prior(image, self.eps,
                                    as_gradient=self.normalized,
                                    normalized=False)


# --------------------------------------------------------------------------
# Pure-JAX references (explicit 3x3 convolution, independent of the kernel)
# --------------------------------------------------------------------------
def _reference_sobel_xy(image):
    x = image.astype(jnp.float32)
    xp = jnp.pad(x, ((0, 0), (0, 0), (1, 1), (1, 1)), mode="edge")
    kx = jnp.array([[-1., 0., 1.], [-2., 0., 2.], [-1., 0., 1.]], jnp.float32)
    ky = kx.T
    B, C, H, W = x.shape
    gx = jnp.zeros_like(x)
    gy = jnp.zeros_like(x)
    for a in range(3):
        for b in range(3):
            win = xp[:, :, a:a + H, b:b + W]
            gx = gx + kx[a, b] * win
            gy = gy + ky[a, b] * win
    return gx, gy


def _reference_binary(image, eps=0.05):
    # Same mathematical form as the kernel: m2 > eps^2 * max(m2) is exactly
    # equivalent to sqrt(m2)/g_max > eps (all quantities positive).
    gx, gy = _reference_sobel_xy(image)
    m2 = gx * gx + gy * gy + 1e-6
    thr = (eps * eps) * jnp.max(m2)
    return (m2 > thr).astype(jnp.float32)


def _reference_gradient(image):
    gx, gy = _reference_sobel_xy(image)
    grad = jnp.sqrt(gx * gx + gy * gy + 1e-6)
    return grad / jnp.max(grad)


if __name__ == "__main__":
    key = jax.random.PRNGKey(0)
    x = jax.random.uniform(key, (2, 3, 16, 16), dtype=jnp.float32)  # RGB in [0,1]

    # Default module: binary boundary prior.
    module = BoundaryAwarePrior(eps=0.05, normalized=False)
    out = jax.block_until_ready(module(x))
    assert out.shape == x.shape
    assert out.dtype == jnp.float32

    ref = _reference_binary(x, eps=0.05)
    assert bool(jnp.all(out == ref)), "binary boundary prior mismatch vs reference"

    # as_gradient path (what the original forward hits when normalized=True).
    grad_out = jax.block_until_ready(boundary_aware_prior(x, as_gradient=True))
    grad_ref = _reference_gradient(x)
    assert bool(jnp.allclose(grad_out, grad_ref, rtol=1e-5, atol=1e-6)), \
        "gradient prior mismatch vs reference"

    print("KERNEL_OK")
</pallas_src>

<mosaic_0001>
module attributes {stable_mosaic.version = 11 : i64} {
  func.func @_max_pass_kernel(%arg0: i32, %arg1: memref<1x16x16xf32, #tpu.memory_space<vmem>>, %arg2: memref<8x128xf32, #tpu.memory_space<vmem>>) attributes {dimension_semantics = [#tpu.dimension_semantics<arbitrary>], iteration_bounds = array<i64: 6>, scalar_prefetch = 0 : i64, scratch_operands = 0 : i64, tpu.core_type = #tpu.core_type<tc>, window_params = [{transform_indices = @transform_0, window_bounds = array<i64: 1, 16, 16>}, {pipeline_mode = #tpu.pipeline_mode<synchronous>, transform_indices = @transform_1, window_bounds = array<i64: 8, 128>}]} {
    %c0_i32 = arith.constant 0 : i32
    %0 = arith.cmpi eq, %arg0, %c0_i32 : i32
    %1 = arith.extui %0 : i1 to i32
    %c0_i32_0 = arith.constant 0 : i32
    %2 = arith.cmpi ne, %1, %c0_i32_0 : i32
    scf.if %2 {
      %cst_10 = arith.constant 0.000000e+00 : f32
      %51 = vector.broadcast %cst_10 : f32 to vector<8x128xf32>
      %c0_11 = arith.constant 0 : index
      %c0_12 = arith.constant 0 : index
      %52 = vector.load %arg2[%c0_11, %c0_12] : memref<8x128xf32, #tpu.memory_space<vmem>>, vector<8x128xf32>
      tpu.vector_store %arg2[%c0_11, %c0_12], %51 {strides = array<i32>} : memref<8x128xf32, #tpu.memory_space<vmem>>, vector<8x128xf32>,
    } else {
    }
    %c0 = arith.constant 0 : index
    %c0_1 = arith.constant 0 : index
    %c0_2 = arith.constant 0 : index
    %3 = vector.load %arg1[%c0, %c0_1, %c0_2] : memref<1x16x16xf32, #tpu.memory_space<vmem>>, vector<1x16x16xf32>
    %4 = vector.extract_strided_slice %3 {offsets = [0, 0, 0], sizes = [1, 1, 16], strides = [1, 1, 1]} : vector<1x16x16xf32> to vector<1x1x16xf32>
    %5 = vector.extract_strided_slice %3 {offsets = [0, 0, 0], sizes = [1, 15, 16], strides = [1, 1, 1]} : vector<1x16x16xf32> to vector<1x15x16xf32>
    %6 = tpu.concatenate %4, %5 in 1 : vector<1x1x16xf32>, vector<1x15x16xf32> -> vector<1x16x16xf32>
    %7 = vector.extract_strided_slice %3 {offsets = [0, 1, 0], sizes = [1, 15, 16], strides = [1, 1, 1]} : vector<1x16x16xf32> to vector<1x15x16xf32>
    %8 = vector.extract_strided_slice %3 {offsets = [0, 15, 0], sizes = [1, 1, 16], strides = [1, 1, 1]} : vector<1x16x16xf32> to vector<1x1x16xf32>
    %9 = tpu.concatenate %7, %8 in 1 : vector<1x15x16xf32>, vector<1x1x16xf32> -> vector<1x16x16xf32>
    %cst = arith.constant 2.000000e+00 : f32
    %10 = vector.broadcast %cst : f32 to vector<1x16x16xf32>
    %11 = arith.mulf %10, %3 : vector<1x16x16xf32>
    %12 = arith.addf %6, %11 : vector<1x16x16xf32>
    %13 = arith.addf %12, %9 : vector<1x16x16xf32>
    %14 = vector.extract_strided_slice %13 {offsets = [0, 0, 1], sizes = [1, 16, 15], strides = [1, 1, 1]} : vector<1x16x16xf32> to vector<1x16x15xf32>
    %15 = vector.extract_strided_slice %13 {offsets = [0, 0, 15], sizes = [1, 16, 1], strides = [1, 1, 1]} : vector<1x16x16xf32> to vector<1x16x1xf32>
    %16 = tpu.concatenate %14, %15 in 2 : vector<1x16x15xf32>, vector<1x16x1xf32> -> vector<1x16x16xf32>
    %17 = vector.extract_strided_slice %13 {offsets = [0, 0, 0], sizes = [1, 16, 1], strides = [1, 1, 1]} : vector<1x16x16xf32> to vector<1x16x1xf32>
    %18 = vector.extract_strided_slice %13 {offsets = [0, 0, 0], sizes = [1, 16, 15], strides = [1, 1, 1]} : vector<1x16x16xf32> to vector<1x16x15xf32>
    %19 = tpu.concatenate %17, %18 in 2 : vector<1x16x1xf32>, vector<1x16x15xf32> -> vector<1x16x16xf32>
    %20 = arith.subf %16, %19 : vector<1x16x16xf32>
    %21 = vector.extract_strided_slice %3 {offsets = [0, 0, 0], sizes = [1, 16, 1], strides = [1, 1, 1]} : vector<1x16x16xf32> to vector<1x16x1xf32>
    %22 = vector.extract_strided_slice %3 {offsets = [0, 0, 0], sizes = [1, 16, 15], strides = [1, 1, 1]} : vector<1x16x16xf32> to vector<1x16x15xf32>
    %23 = tpu.concatenate %21, %22 in 2 : vector<1x16x1xf32>, vector<1x16x15xf32> -> vector<1x16x16xf32>
    %24 = vector.extract_strided_slice %3 {offsets = [0, 0, 1], sizes = [1, 16, 15], strides = [1, 1, 1]} : vector<1x16x16xf32> to vector<1x16x15xf32>
    %25 = vector.extract_strided_slice %3 {offsets = [0, 0, 15], sizes = [1, 16, 1], strides = [1, 1, 1]} : vector<1x16x16xf32> to vector<1x16x1xf32>
    %26 = tpu.concatenate %24, %25 in 2 : vector<1x16x15xf32>, vector<1x16x1xf32> -> vector<1x16x16xf32>
    %cst_3 = arith.constant 2.000000e+00 : f32
    %27 = vector.broadcast %cst_3 : f32 to vector<1x16x16xf32>
    %28 = arith.mulf %27, %3 : vector<1x16x16xf32>
    %29 = arith.addf %23, %28 : vector<1x16x16xf32>
    %30 = arith.addf %29, %26 : vector<1x16x16xf32>
    %31 = vector.extract_strided_slice %30 {offsets = [0, 1, 0], sizes = [1, 15, 16], strides = [1, 1, 1]} : vector<1x16x16xf32> to vector<1x15x16xf32>
    %32 = vector.extract_strided_slice %30 {offsets = [0, 15, 0], sizes = [1, 1, 16], strides = [1, 1, 1]} : vector<1x16x16xf32> to vector<1x1x16xf32>
    %33 = tpu.concatenate %31, %32 in 1 : vector<1x15x16xf32>, vector<1x1x16xf32> -> vector<1x16x16xf32>
    %34 = vector.extract_strided_slice %30 {offsets = [0, 0, 0], sizes = [1, 1, 16], strides = [1, 1, 1]} : vector<1x16x16xf32> to vector<1x1x16xf32>
    %35 = vector.extract_strided_slice %30 {offsets = [0, 0, 0], sizes = [1, 15, 16], strides = [1, 1, 1]} : vector<1x16x16xf32> to vector<1x15x16xf32>
    %36 = tpu.concatenate %34, %35 in 1 : vector<1x1x16xf32>, vector<1x15x16xf32> -> vector<1x16x16xf32>
    %37 = arith.subf %33, %36 : vector<1x16x16xf32>
    %38 = arith.mulf %20, %20 : vector<1x16x16xf32>
    %39 = arith.mulf %37, %37 : vector<1x16x16xf32>
    %40 = arith.addf %38, %39 : vector<1x16x16xf32>
    %cst_4 = arith.constant 9.99999997E-7 : f32
    %41 = vector.broadcast %cst_4 : f32 to vector<1x16x16xf32>
    %42 = arith.addf %40, %41 : vector<1x16x16xf32>
    %c0_5 = arith.constant 0 : index
    %c0_6 = arith.constant 0 : index
    %43 = vector.load %arg2[%c0_5, %c0_6] : memref<8x128xf32, #tpu.memory_space<vmem>>, vector<8x128xf32>
    %44 = vector.shape_cast %42 : vector<1x16x16xf32> to vector<1x1x16x16xf32>
    %cst_7 = arith.constant dense<0xFF800000> : vector<1xf32>
    %45 = vector.multi_reduction <maximumf>, %44, %cst_7 [1, 2, 3] : vector<1x1x16x16xf32> to vector<1xf32>
    %46 = vector.shape_cast %45 : vector<1xf32> to vector<1x1x1x1xf32>
    %47 = vector.extract %46[0, 0, 0, 0] : f32 from vector<1x1x1x1xf32>
    %48 = vector.broadcast %47 : f32 to vector<8x128xf32>
    %49 = arith.maximumf %43, %48 : vector<8x128xf32>
    %c0_8 = arith.constant 0 : index
    %c0_9 = arith.constant 0 : index
    %50 = vector.load %arg2[%c0_8, %c0_9] : memref<8x128xf32, #tpu.memory_space<vmem>>, vector<8x128xf32>
    tpu.vector_store %arg2[%c0_8, %c0_9], %49 {strides = array<i32>} : memref<8x128xf32, #tpu.memory_space<vmem>>, vector<8x128xf32>,
    return
  }
  func.func @transform_0(%arg0: i32) -> (i32, i32, i32) {
    %c0_i32 = arith.constant 0 : i32
    %c0_i32_0 = arith.constant 0 : i32
    %c0_i32_1 = arith.constant 0 : i32
    return %arg0, %c0_i32, %c0_i32_0 : i32, i32, i32
  }
  func.func @transform_1(%arg0: i32) -> (i32, i32) {
    %c0_i32 = arith.constant 0 : i32
    %c0_i32_0 = arith.constant 0 : i32
    %c0_i32_1 = arith.constant 0 : i32
    return %c0_i32, %c0_i32_0 : i32, i32
  }
}

</mosaic_0001>

<bundles_post_ra>
// kernel: tpu_custom_call.1
= control target key start
LH: loop header
LB: loop body
LE: loop exit
PB: predicated region body
PF: predicated region fallthrough
CT: control target
= control target key end

     0   :  { %6 = vsyncpa [#allocation3], 0  ;;  %s585_s0 = inlined_call_operand.hbm [shape: f32[6,16,16], index: 0, kind: input, shape index: {}]   ;;  %s586_s1 = inlined_call_operand.hbm [shape: f32[8,128], index: 1, kind: output, shape index: {}]  }
   0x1   :  { %8 = vsyncpa [#allocation3 + $0x1], 0 }
   0x2   :  { %9 = vsyncpa [#allocation4], 0  ;;  %s477_s6 = smov 0   ;;  %s479_s7 = smov 0  }
   0x3   :  { %s481_s8 = smov 0   ;;  %s483_s9 = smov 0  }
   0x4 LB: > { %s496_s10 = sadd.s32 4294967295, %s459_s9   ;;  %s499_s11 = sadd.s32 1, %s459_s9   ;;  %s459_s9 = sphi %s483_s9, %s593_s9   ;;  %s455_s8 = sphi %s481_s8, %s592_s8   ;;  %s451_s7 = sphi %s479_s7, %s591_s7   ;;  %s447_s6 = sphi %s477_s6, %s590_s6  }
   0x5   : > { %s19_s12 = ssub.s32 %s459_s9, %s499_s11  ;;  %s22_s13 = sadd.s32 1, %s455_s8 }
   0x6   : > { %p20_p0 = scmp.eq.s32.totalorder %s19_s12, 0  ;;  %p29_p1 = scmp.ne.s32.totalorder %s455_s8, %s451_s7 }
   0x7   : > { %p30_p2 = scmp.eq.s32.totalorder %s459_s9, 0  ;;  %p35_p3 = scmp.ne.s32.totalorder %s451_s7, %s447_s6 }
   0x8   : > { %s509_s14 = scalar_select %p20_p0, %s455_s8, %s22_s13  }
   0x9   : > { %p511_p4 = por %p30_p2, %p29_p1  ;;  %p36_p5 = scmp.eq.s32.totalorder %s496_s10, 0 }
   0xa   : > { %p322_p6 = scmp.lt.s32.totalorder %s459_s9, 6  ;;  %s80_s17 = sand.u32 1, %s455_s8  }
   0xb   : > { %p517_p7 = por %p36_p5, %p35_p3  ;;  %s299_s18 = sshll.u32 %s80_s17, 4 }
   0xc   : > { %s309_s19 = sshll.u32 %s459_s9, 4  ;;  %s84_s23 = scalar_lea.vmem [#allocation2], %s299_s18 }
   0xd   : > { %s89_s22 = scalar_lea.hbm %s585_s0, %s309_s19  ;;  %s92_s24 = sshll.u32 %s84_s23, 4  ;;  %s93_s24 = int_to_ptr.vmem [resolvable:$true] %s92_s24 }
   0xe   : > { %s90_s25 = sshll.u32 %s89_s22, 4  ;;  %p528_p8 = pnand %p322_p6, %p511_p4  ;;  %s91_s25 = int_to_ptr.hbm [resolvable:$true] %s90_s25 }
   0xf   : > { %p302_p9 = scmp.ge.s32.totalorder %s459_s9, 1  ;;  %s81_s27 = scalar_lea.sflag [#allocation3], %s80_s17 }
  0x10   : > { %s363_s28 = sshra.s32 %s91_s25, 4  ;;  %p367_p11 = pneg %p528_p8  ;;  %s364_s28 = int_to_ptr.hbm [resolvable:$true] %s363_s28 }
  0x11   : > { %s365_s29 = scalar_lea.hbm %s364_s28, 16  ;;  %s370_s3 = scalar_lea.hbm %s585_s0, 96 }
  0x12   : > { %p366_p10 = scmp.ne.s32.totalorder %s364_s28, %s365_s29  ;;  %p371_p0 = scmp.lt.s32.totalorder %s364_s28, %s585_s0 }
  0x13   : > { %p372_p1 = scmp.lt.s32.totalorder %s370_s3, %s365_s29 }
  0x14   : > { %p368_p12 = pnand %p367_p11, %p366_p10 }
  0x15   : > { %p373_p2 = por %p372_p1, %p371_p0 }
  0x16   : > { %p369_p13 = pneg %p368_p12 }
  0x18   : > { %p374_p3 = pnand %p373_p2, %p369_p13 }
  0x1a   : > { %377 = shalt.err (!%p374_p3)
}
  0x1b   : > { %s461_s6 = smov 128   ;;  %s462_s12 = smov 8  }
  0x1c   : > { %321 = dma.hbm_to_vmem [thread:$0]  (!%p528_p8), %s91_s25, 256, %s93_s24, %s81_s27, %s461_s6, %s461_s6, %s462_s12  }
  0x1d   : > { %p100_p4 = scmp.lt.s32.totalorder %s459_s9, 7 }
  0x1f   : > { %p101_p5 = pnand %p302_p9, %p100_p4 }
  0x20   : > { %s106_s13 = sand.u32 (!%p101_p5), 1, %s451_s7  }
  0x21   : > { %104 = sbr.rel (%p101_p5) target bundleno = 377 (0x179), region = 24  ;;  %s303_s15 = sshll.u32 (!%p101_p5), %s106_s13, 4 }
  0x22   : > { %s107_s17 = scalar_lea.sflag (!%p101_p5), [#allocation3], %s106_s13  ;;  %s110_s18 = scalar_lea.vmem (!%p101_p5), [#allocation2], %s303_s15 }
  0x26   : > { %438 = dma.done.wait (%p517_p7), %s107_s17, 256  }
  0x27   : > { %440 = vsyncadd (%p517_p7), %s107_s17, 4294967040  ;;  %p304_p6 = scmp.ne.s32.totalorder %s496_s10, 0 }
  0x29   : > { %128 = sbr.rel (%p304_p6) target bundleno = 48 (0x30), region = 32 }
  0x2e   : > { %v463_v0 = vmov 0.0  }
  0x2f   : > { %129 = vst [vmem:[#allocation5] sm:$0xff] %v463_v0 }
  0x30 PF: > { %v130_v1 = vld [vmem:[%s110_s18] sm:$0xff]  ;;  %v131_v2 = vld [vmem:[%s110_s18 + $0x8] sm:$0xff]  ;;  %vm134_vm0 = vcmask 1040384   ;;  %vm141_vm1 = vcmask 1046528   ;;  %s464_s9 = smov 127   ;;  %s465_s19 = smov 1  }
  0x31   : > { %184 = vrot.lane.b32.xlu1 %v130_v1, %s464_s9  ;;  %176 = vrot.lane.b32.xlu0 %v130_v1, %s465_s19  ;;  %v135_v3 = vrot.slane %v130_v1, 7  ;;  %v142_v4 = vrot.slane %v130_v1, 1  ;;  %v143_v5 = vrot.slane %v131_v2, 1  ;;  %v148_v6 = vmul.f32 2.0, %v130_v1  ;;  %s466_s16 = smov [#allocation5]   ;;  %s245_s23 = sshll.u32 %s586_s1, 4  ;;  %s246_s23 = int_to_ptr.hbm [resolvable:$true] %s245_s23 }
  0x32   : > { %v136_v7 = vrot.slane %v131_v2, 7  ;;  %v149_v11 = vmul.f32 2.0, %v131_v2  ;;  %vm171_vm2 = vcmask 7168   ;;  %vm162_vm3 = vcmask 121856   ;;  %s243_s20 = sshll.u32 %s466_s16, 4  ;;  %p323_p7 = scmp.eq.s32.totalorder %s496_s10, 5  ;;  %s244_s20 = int_to_ptr.vmem [resolvable:$true] %s243_s20 }
  0x33   : > { %v140_v8 = vsel %vm134_vm0, %v130_v1, %v135_v3  ;;  %v144_v9 = vsel %vm141_vm1, %v142_v4, %v143_v5  ;;  %v147_v15 = vsel %vm141_vm1, %v143_v5, %v131_v2  ;;  %vm221_vm4 = vcmask 130048  }
  0x34   : > { %v150_v10 = vadd.f32 %v148_v6, %v140_v8  ;;  %v137_v13 = vsel %vm134_vm0, %v135_v3, %v136_v7 }
  0x35   : > { %v151_v14 = vadd.f32 %v149_v11, %v137_v13 }
  0x36   : > { %v152_v12 = vadd.f32 %v150_v10, %v144_v9  ;;  %v220_v3 = vld [vmem:[#allocation5] sm:$0xff] }
  0x37   : > { %v153_v16 = vadd.f32 %v151_v14, %v147_v15 }
  0x38   : > { %156 = vrot.lane.b32.xlu2 %v152_v12, %s464_s9 }
  0x39   : > { %186 = vrot.lane.b32.xlu1 %v131_v2, %s464_s9  ;;  %178 = vrot.lane.b32.xlu0 %v131_v2, %s465_s19 }
  0x40   : > { %158 = vrot.lane.b32.xlu2 %v153_v16, %s464_s9 }
  0x41   : > { %165 = vrot.lane.b32.xlu0 %v152_v12, %s465_s19  ;;  %167 = vrot.lane.b32.xlu1 %v153_v16, %s465_s19 }
  0x92   : > { %v157_v20 = vpop.permute.xlu2 %156 }
  0x93   : > { %v163_v35 = vsel %vm162_vm3, %v157_v20, %v152_v12 }
  0x9a   : > { %v159_v31 = vpop.permute.xlu2 %158 }
  0x9b   : > { %v164_v36 = vsel %vm162_vm3, %v159_v31, %v153_v16 }
  0xa3   : > { %v185_v17 = vpop.permute.xlu1 %184  ;;  %v177_v18 = vpop.permute.xlu0 %176 }
  0xa4   : > { %v182_v19 = vsel %vm171_vm2, %v130_v1, %v177_v18  ;;  %v190_v22 = vsel %vm162_vm3, %v185_v17, %v130_v1 }
  0xa5   : > { %v192_v21 = vadd.f32 %v182_v19, %v148_v6 }
  0xa7   : > { %v194_v23 = vadd.f32 %v192_v21, %v190_v22 }
  0xa9   : > { %v204_v29 = vrot.slane %v194_v23, 7  ;;  %v198_v32 = vrot.slane %v194_v23, 1 }
  0xab   : > { %v187_v24 = vpop.permute.xlu1 %186  ;;  %v179_v25 = vpop.permute.xlu0 %178  ;;  %v209_v42 = vsel %vm134_vm0, %v194_v23, %v204_v29 }
  0xac   : > { %v183_v26 = vsel %vm171_vm2, %v131_v2, %v179_v25  ;;  %v191_v28 = vsel %vm162_vm3, %v187_v24, %v131_v2 }
  0xad   : > { %v193_v27 = vadd.f32 %v183_v26, %v149_v11 }
  0xaf   : > { %v195_v30 = vadd.f32 %v193_v27, %v191_v28 }
  0xb1   : > { %v199_v33 = vrot.slane %v195_v30, 1  ;;  %v205_v34 = vrot.slane %v195_v30, 7 }
  0xb3   : > { %v166_v37 = vpop.permute.xlu0 %165  ;;  %v168_v38 = vpop.permute.xlu1 %167  ;;  %v200_v39 = vsel %vm141_vm1, %v198_v32, %v199_v33  ;;  %v203_v40 = vsel %vm141_vm1, %v199_v33, %v195_v30  ;;  %v206_v41 = vsel %vm134_vm0, %v204_v29, %v205_v34 }
  0xb4   : > { %v172_v43 = vsel %vm171_vm2, %v152_v12, %v166_v37  ;;  %v173_v44 = vsel %vm171_vm2, %v153_v16, %v168_v38  ;;  %v210_v45 = vsub.f32 %v200_v39, %v209_v42  ;;  %v211_v46 = vsub.f32 %v203_v40, %v206_v41 }
  0xb5   : > { %v174_v47 = vsub.f32 %v163_v35, %v172_v43  ;;  %v175_v48 = vsub.f32 %v164_v36, %v173_v44 }
  0xb6   : > { %v214_v49 = vmul.f32 %v210_v45, %v210_v45  ;;  %v215_v50 = vmul.f32 %v211_v46, %v211_v46 }
  0xb7   : > { %v212_v51 = vmul.f32 %v174_v47, %v174_v47  ;;  %v213_v52 = vmul.f32 %v175_v48, %v175_v48 }
  0xb9   : > { %v216_v53 = vadd.f32 %v214_v49, %v212_v51  ;;  %v217_v54 = vadd.f32 %v215_v50, %v213_v52 }
  0xbb   : > { %v218_v55 = vadd.f32 1e-06, %v216_v53  ;;  %v219_v56 = vadd.f32 1e-06, %v217_v54 }
  0xbd   : > { %v222_v57 = vsel %vm221_vm4, %v218_v55, -inf  ;;  %v223_v58 = vsel %vm221_vm4, %v219_v56, -inf }
  0xbe   : > { %v224_v59 = vmax.f32 %v222_v57, %v223_v58 }
  0xc0   : > { %225 = vmax.xlane.f32.xlu2 %v224_v59 }
 0x133   : > { %v226_v60 = vpop.xlane.xlu2 %225 }
 0x134   : > { %v227_v61 = vrot.slane %v226_v60, 4 }
 0x136   : > { %v228_v62 = vmax.f32 %v226_v60, %v227_v61 }
 0x138   : > { %v229_v63 = vrot.slane %v228_v62, 2 }
 0x13a   : > { %v230_v0 = vmax.f32 %v228_v62, %v229_v63 }
 0x13c   : > { %v231_v1 = vrot.slane %v230_v0, 1 }
 0x13e   : > { %v232_v2 = vmax.f32 %v230_v0, %v231_v1 }
 0x140   : > { %310 = vpush %v232_v2 }
 0x171   : > { %s311_s24 = spop %310 }
 0x172   : > { %v234_v4 = vstv %s311_s24 }
 0x173   : > { %v235_v5 = vmax.f32 %v220_v3, %v234_v4 }
 0x175   : > { %236 = vst [vmem:[#allocation5] sm:$0xff] %v235_v5 }
 0x176   : > { %315 = dma.vmem_to_hbm [thread:$0]  (%p323_p7), %s244_s20, 128, %s246_s23, [#allocation4]  }
 0x177   : > { %442 = dma.done.wait (%p323_p7), [#allocation4], 128  }
 0x178   : > { %444 = vsyncadd (%p323_p7), [#allocation4], 4294967168 }
 0x179 PF: > { %p12_p8 = scmp.ge.s32.totalorder %s499_s11, 8   ;;  %s590_s6 = smov %s451_s7 }
 0x17a   : > { %s591_s7 = smov %s455_s8  ;;  %s592_s8 = smov %s509_s14 }
 0x17b   : > { %s593_s9 = smov %s499_s11  ;;  %14 = sbr.rel (!%p12_p8) target bundleno = 4 (0x4), region = 65 }
 0x180   :  { %259 = vsyncpa [#allocation3], 1 }
 0x181   :  { %261 = vsyncpa [#allocation3 + $0x1], 1 }
 0x182   :  { %262 = vsyncpa [#allocation4], 1 }
 0x183   :  { %264 = vsyncpa [#allocation4 + $0x1], 1 }

</bundles_post_ra>
